<compile_context>
chip_gen: v7x
topology: tpu7x:2x2x1
jax: 0.10.0
libtpu: 0.0.40
codegen_flags: <defaults>
</compile_context>

<pallas_src>
import jax
import jax.numpy as jnp
from jax.experimental import pallas as pl
from jax.experimental.pallas import tpu as pltpu

LEAK = 0.01      # nn.LeakyReLU() default negative_slope
BN_EPS = 1e-5    # nn.BatchNorm1d default eps


def _lrelu(x):
    return jnp.where(x > 0, x, LEAK * x)


def _round_up(n, m):
    return ((n + m - 1) // m) * m


def _block_diag(blocks):
    rows = sum(b.shape[0] for b in blocks)
    cols = sum(b.shape[1] for b in blocks)
    out = jnp.zeros((rows, cols), blocks[0].dtype)
    r = c = 0
    for b in blocks:
        out = out.at[r:r + b.shape[0], c:c + b.shape[1]].set(b)
        r += b.shape[0]
        c += b.shape[1]
    return out


# ----------------------------------------------------------------------------- params


def make_params(key, input_size=12, output_size=3,
                hidden_sizes=(32, 32, 32), conversion_sizes=(16, 4)):
    """Deterministic synthetic parameters with the same shapes as the PyTorch module.

    Weights are stored as (in_features, out_features) so the pure-JAX reference is
    simply y = x @ W + b (identical math to nn.Linear)."""
    keys = jax.random.split(key, 16)
    k = iter(keys)

    def lin(kk, fan_in, fan_out):
        bound = 1.0 / jnp.sqrt(fan_in)
        w = jax.random.uniform(kk, (fan_in, fan_out), jnp.float32, -bound, bound)
        b = jax.random.uniform(jax.random.fold_in(kk, 1), (1, fan_out),
                               jnp.float32, -bound, bound)
        return w, b

    p = {}
    p["w_in"], p["b_in"] = lin(next(k), input_size, hidden_sizes[0])

    n_hidden = len(hidden_sizes) - 1
    w_h, b_h = [], []
    for i in range(n_hidden):
        w, b = lin(next(k), hidden_sizes[i], hidden_sizes[i + 1])
        w_h.append(w)
        b_h.append(b[None])
    p["w_h"] = jnp.stack(w_h)                                   # (n_hidden, 32, 32)
    p["b_h"] = jnp.concatenate(b_h)                             # (n_hidden, 1, 32) (reference only)
    p["gamma"] = jnp.ones((n_hidden, 1, hidden_sizes[-1]), jnp.float32)
    p["beta"] = jnp.zeros((n_hidden, 1, hidden_sizes[-1]), jnp.float32)

    wc0, bc0, wc1, bc1, wc2, bc2 = [], [], [], [], [], []
    for _ in range(output_size):
        w, b = lin(next(k), hidden_sizes[-1], conversion_sizes[0])
        wc0.append(w); bc0.append(b[None])
        w, b = lin(next(k), conversion_sizes[0], conversion_sizes[1])
        wc1.append(w); bc1.append(b[None])
        w, b = lin(next(k), conversion_sizes[1], 1)
        wc2.append(w); bc2.append(b[None])
    p["wc0"] = jnp.stack(wc0); p["bc0"] = jnp.concatenate(bc0)  # (3,32,16), (3,1,16)
    p["wc1"] = jnp.stack(wc1); p["bc1"] = jnp.concatenate(bc1)  # (3,16,4),  (3,1,4)
    p["wc2"] = jnp.stack(wc2); p["bc2"] = jnp.concatenate(bc2)  # (3,4,1),   (3,1,1)
    return p


# ----------------------------------------------------------------------------- packing


def _pack_params(p, use_bf16=False):
    """Fuse the conversion heads and pack everything into two slabs (done ONCE).

    Returns (w_pack, v_pack, layout):
      w_pack : (R, 48) — all weight matrices in (out, in) orientation, each
               zero-padded to a multiple-of-8 row count and 48 columns, stacked
               along rows (sublane-aligned offsets).  bf16 if use_bf16.
      v_pack : (48, 8) f32 — bias / gamma / beta COLUMN vectors (feature-major),
               zero-padded, one per column.
      layout : static sizes / offsets consumed by the kernel closure.
    """
    isz = p["w_in"].shape[0]
    n_hidden = p["w_h"].shape[0]
    hsz = p["w_h"].shape[2]
    n_out = p["wc0"].shape[0]

    # fuse the three conversion heads (block-diagonal => no cross-head mixing)
    wc0_f = jnp.concatenate([p["wc0"][j] for j in range(n_out)], axis=1)   # (32, 48)
    bc0_f = jnp.concatenate([p["bc0"][j] for j in range(n_out)], axis=1)   # (1, 48)
    wc1_f = _block_diag([p["wc1"][j] for j in range(n_out)])               # (48, 12)
    bc1_f = jnp.concatenate([p["bc1"][j] for j in range(n_out)], axis=1)   # (1, 12)
    wc2_f = _block_diag([p["wc2"][j] for j in range(n_out)])               # (12, 3)
    bc2_f = jnp.concatenate([p["bc2"][j] for j in range(n_out)], axis=1)   # (1, 3)

    c0f = wc0_f.shape[1]                    # 48
    c1f = wc1_f.shape[1]                    # 12
    c1p = _round_up(c1f, 8)                 # 16 (padded head-mid width)
    c2p = _round_up(n_out, 8)               # 8  (padded output rows)

    # ---- weight slab: (out, in) orientation for the feature-major y = W @ h ----
    mats = ([("w_in", p["w_in"].T)]                                         # (32, 12)
            + [(f"w_h{i}", p["w_h"][i].T) for i in range(n_hidden)]         # (32, 32)
            + [("wc0", wc0_f.T), ("wc1", wc1_f.T), ("wc2", wc2_f.T)])       # (48,32)(12,48)(3,12)
    ncols = max(m.shape[1] for _, m in mats)                                # 48

    offsets, chunks, r = {}, [], 0
    for name, m in mats:
        offsets[name] = r
        pr = _round_up(m.shape[0], 8)
        chunks.append(jnp.pad(m, ((0, pr - m.shape[0]), (0, ncols - m.shape[1]))))
        r += pr
    w_pack = jnp.concatenate(chunks, axis=0)                                # (168, 48)
    if use_bf16:
        w_pack = w_pack.astype(jnp.bfloat16)

    # ---- vector slab: column vectors (feature-major), f32 always ----
    nvrows = _round_up(max(hsz, c0f, c1f, n_out), 8)                        # 48
    v_col, cols = {}, []

    def add(name, row_vec):                      # row_vec: (1, F)
        v_col[name] = len(cols)
        f = row_vec.shape[1]
        cols.append(jnp.pad(row_vec.reshape(f), (0, nvrows - f)))

    add("b_in", p["b_in"])
    for i in range(n_hidden):
        add(f"g{i}", p["gamma"][i])
        add(f"b{i}", p["beta"][i])
    add("bc0", bc0_f)
    add("bc1", bc1_f)
    add("bc2", bc2_f)
    v_pack = jnp.stack(cols, axis=1).astype(jnp.float32)                    # (48, 8)

    layout = dict(isz=isz, hsz=hsz, n_hidden=n_hidden, n_out=n_out,
                  c0f=c0f, c1p=c1p, c2p=c2p, w_off=offsets, v_col=v_col)
    return w_pack, v_pack, layout


# ----------------------------------------------------------------------------- kernel


def _make_kernel(layout, compute_dtype):
    isz, hsz = layout["isz"], layout["hsz"]
    n_hidden, c0f = layout["n_hidden"], layout["c0f"]
    c1p, c2p = layout["c1p"], layout["c2p"]
    off, vc = layout["w_off"], layout["v_col"]

    def kernel(x_ref, w_ref, v_ref, o_ref):
        # x is feature-major: (isz, B) with the batch on the lane axis.
        x = x_ref[...].astype(compute_dtype)

        # input layer + LeakyReLU : h = lrelu(W_in @ x + b_in)
        w_in = w_ref[off["w_in"]:off["w_in"] + hsz, 0:isz]
        h = _lrelu(jnp.dot(w_in, x, preferred_element_type=jnp.float32)
                   + v_ref[0:hsz, vc["b_in"]:vc["b_in"] + 1])

        # hidden layers: Linear (bias dropped — cancelled by training-mode BN)
        #                -> BatchNorm1d (fused one-pass stats) -> LeakyReLU
        for i in range(n_hidden):
            r0 = off[f"w_h{i}"]
            y = jnp.dot(w_ref[r0:r0 + hsz, 0:hsz], h.astype(compute_dtype),
                        preferred_element_type=jnp.float32)          # (hsz, B) f32
            mean = jnp.mean(y, axis=1, keepdims=True)                 # (hsz, 1)
            msq = jnp.mean(y * y, axis=1, keepdims=True)
            var = msq - mean * mean                                   # biased variance
            gamma = v_ref[0:hsz, vc[f"g{i}"]:vc[f"g{i}"] + 1]
            beta = v_ref[0:hsz, vc[f"b{i}"]:vc[f"b{i}"] + 1]
            scale = gamma * jax.lax.rsqrt(var + BN_EPS)               # rsqrt -> EUP slot
            shift = beta - mean * scale
            h = _lrelu(y * scale + shift)

        # fused conversion heads: 3 wide matmuls, one lane-dense output store.
        # Every layer (including the last 4->1) is followed by LeakyReLU (as in PyTorch).
        t = _lrelu(jnp.dot(w_ref[off["wc0"]:off["wc0"] + c0f, 0:hsz],
                           h.astype(compute_dtype),
                           preferred_element_type=jnp.float32)
                   + v_ref[0:c0f, vc["bc0"]:vc["bc0"] + 1])           # (48, B)
        t = _lrelu(jnp.dot(w_ref[off["wc1"]:off["wc1"] + c1p, 0:c0f],
                           t.astype(compute_dtype),
                           preferred_element_type=jnp.float32)
                   + v_ref[0:c1p, vc["bc1"]:vc["bc1"] + 1])           # (16, B); rows 12..15 == 0
        o_ref[...] = _lrelu(jnp.dot(w_ref[off["wc2"]:off["wc2"] + c2p, 0:c1p],
                                    t.astype(compute_dtype),
                                    preferred_element_type=jnp.float32)
                            + v_ref[0:c2p, vc["bc2"]:vc["bc2"] + 1])  # (8, B); rows 3..7 == 0

    return kernel


# ----------------------------------------------------------------------------- wrapper


def make_ffn_forward(params, *, use_bf16=False):
    """Pack parameters ONCE and return a jitted forward: (B, 12) -> (B, 3).

    use_bf16=True casts the MXU operands to bf16 (weights at pack time,
    activations right before each dot); all element-wise math stays f32.
    """
    w_pack, v_pack, layout = _pack_params(params, use_bf16=use_bf16)
    kernel = _make_kernel(layout, jnp.bfloat16 if use_bf16 else jnp.float32)
    n_out, out_rows, isz = layout["n_out"], layout["c2p"], layout["isz"]

    # TODO(synk): for very large B, split the batch across v7x's two TensorCores
    # (grid axis marked "parallel") with a cross-core sum / sum-of-squares exchange
    # for the BatchNorm statistics; a single block is correct and sufficient here.

    @jax.jit
    def fwd(x):
        B = x.shape[0]
        xt = x.T                                  # (isz, B) feature-major (free in XLA)
        out_t = pl.pallas_call(
            kernel,
            out_shape=jax.ShapeDtypeStruct((out_rows, B), jnp.float32),
            grid=(1,),
            in_specs=[
                pl.BlockSpec((isz, B), lambda i: (0, 0)),
                pl.BlockSpec(w_pack.shape, lambda i: (0, 0)),
                pl.BlockSpec(v_pack.shape, lambda i: (0, 0)),
            ],
            out_specs=pl.BlockSpec((out_rows, B), lambda i: (0, 0)),
            compiler_params=pltpu.CompilerParams(
                dimension_semantics=("arbitrary",)),
        )(xt, w_pack, v_pack)
        return out_t[:n_out].T                    # back to PyTorch (B, 3) layout

    return fwd


# ----------------------------------------------------------------------------- reference


def ffn_reference(x, p):
    """Pure-JAX reference mirroring the PyTorch module exactly (incl. hidden biases)."""
    h = _lrelu(x @ p["w_in"] + p["b_in"])
    for i in range(p["w_h"].shape[0]):
        y = h @ p["w_h"][i] + p["b_h"][i]
        mean = jnp.mean(y, axis=0, keepdims=True)
        var = jnp.mean((y - mean) ** 2, axis=0, keepdims=True)
        y = p["gamma"][i] * (y - mean) / jnp.sqrt(var + BN_EPS) + p["beta"][i]
        h = _lrelu(y)
    outs = []
    for j in range(p["wc0"].shape[0]):
        t = _lrelu(h @ p["wc0"][j] + p["bc0"][j])
        t = _lrelu(t @ p["wc1"][j] + p["bc1"][j])
        t = _lrelu(t @ p["wc2"][j] + p["bc2"][j])
        outs.append(t)
    return jnp.concatenate(outs, axis=1)


if __name__ == "__main__":
    key = jax.random.PRNGKey(0)
    kx, kp = jax.random.split(key)

    # B = 128 fills the lane axis exactly in the feature-major layout.
    B, INPUT_SIZE = 128, 12
    x = jax.random.normal(kx, (B, INPUT_SIZE), jnp.float32)
    params = make_params(kp)

    ref = ffn_reference(x, params)

    # f32 MXU path: matches the reference up to fp rounding (hidden biases are
    # dropped in-kernel because training-mode BN cancels them exactly).
    fwd = make_ffn_forward(params)
    out = jax.block_until_ready(fwd(x))
    assert out.shape == (B, 3), out.shape
    assert jnp.allclose(out, ref, atol=1e-4, rtol=1e-4), (out, ref)

    # bf16 MXU-operand path (perf option for v6e/v7x): looser tolerance.
    fwd_bf16 = make_ffn_forward(params, use_bf16=True)
    out_bf16 = jax.block_until_ready(fwd_bf16(x))
    assert out_bf16.shape == (B, 3), out_bf16.shape
    assert jnp.allclose(out_bf16, ref, atol=1e-1, rtol=1e-1), (out_bf16, ref)

    print("KERNEL_OK")
</pallas_src>

<mosaic_0001>
module attributes {stable_mosaic.version = 11 : i64} {
  func.func @kernel(%arg0: i32, %arg1: memref<12x128xf32, #tpu.memory_space<vmem>>, %arg2: memref<168x48xf32, #tpu.memory_space<vmem>>, %arg3: memref<48x8xf32, #tpu.memory_space<vmem>>, %arg4: memref<8x128xf32, #tpu.memory_space<vmem>>) attributes {dimension_semantics = [#tpu.dimension_semantics<arbitrary>], iteration_bounds = array<i64: 1>, scalar_prefetch = 0 : i64, scratch_operands = 0 : i64, tpu.core_type = #tpu.core_type<tc>, window_params = [{pipeline_mode = #tpu.pipeline_mode<synchronous>, transform_indices = @transform_0, window_bounds = array<i64: 12, 128>}, {pipeline_mode = #tpu.pipeline_mode<synchronous>, transform_indices = @transform_1, window_bounds = array<i64: 168, 48>}, {pipeline_mode = #tpu.pipeline_mode<synchronous>, transform_indices = @transform_2, window_bounds = array<i64: 48, 8>}, {pipeline_mode = #tpu.pipeline_mode<synchronous>, transform_indices = @transform_3, window_bounds = array<i64: 8, 128>}]} {
    %c0 = arith.constant 0 : index
    %c0_0 = arith.constant 0 : index
    %0 = vector.load %arg1[%c0, %c0_0] : memref<12x128xf32, #tpu.memory_space<vmem>>, vector<12x128xf32>
    %c0_1 = arith.constant 0 : index
    %c0_2 = arith.constant 0 : index
    %1 = vector.load %arg2[%c0_1, %c0_2] : memref<168x48xf32, #tpu.memory_space<vmem>>, vector<32x12xf32>
    %cst = arith.constant dense<0.000000e+00> : vector<32x128xf32>
    %2 = tpu.matmul %1, %0, %cst {dimension_numbers = #tpu.dot_dimension_numbers<[1], [0], [0], [1], [0, 0, 1, 1], [], []>} : vector<32x12xf32>, vector<12x128xf32>, vector<32x128xf32> -> vector<32x128xf32>
    %c0_3 = arith.constant 0 : index
    %c0_4 = arith.constant 0 : index
    %3 = vector.load %arg3[%c0_3, %c0_4] : memref<48x8xf32, #tpu.memory_space<vmem>>, vector<32x1xf32>
    %4 = vector.broadcast %3 : vector<32x1xf32> to vector<32x128xf32>
    %5 = arith.addf %2, %4 : vector<32x128xf32>
    %cst_5 = arith.constant 0.000000e+00 : f32
    %6 = vector.broadcast %cst_5 : f32 to vector<32x128xf32>
    %7 = arith.cmpf ogt, %5, %6 : vector<32x128xf32>
    %cst_6 = arith.constant 0.00999999977 : f32
    %8 = vector.broadcast %cst_6 : f32 to vector<32x128xf32>
    %9 = arith.mulf %8, %5 : vector<32x128xf32>
    %10 = arith.select %7, %5, %9 : vector<32x128xi1>, vector<32x128xf32>
    %c32 = arith.constant 32 : index
    %c0_7 = arith.constant 0 : index
    %11 = vector.load %arg2[%c32, %c0_7] : memref<168x48xf32, #tpu.memory_space<vmem>>, vector<32x32xf32>
    %cst_8 = arith.constant dense<0.000000e+00> : vector<32x128xf32>
    %12 = tpu.matmul %11, %10, %cst_8 {dimension_numbers = #tpu.dot_dimension_numbers<[1], [0], [0], [1], [0, 0, 1, 1], [], []>} : vector<32x32xf32>, vector<32x128xf32>, vector<32x128xf32> -> vector<32x128xf32>
    %cst_9 = arith.constant dense<0.000000e+00> : vector<32xf32>
    %13 = vector.multi_reduction <add>, %12, %cst_9 [1] : vector<32x128xf32> to vector<32xf32>
    %14 = vector.shape_cast %13 : vector<32xf32> to vector<32x1xf32>
    %cst_10 = arith.constant 1.280000e+02 : f32
    %15 = vector.broadcast %cst_10 : f32 to vector<32x1xf32>
    %16 = arith.divf %14, %15 : vector<32x1xf32>
    %17 = arith.mulf %12, %12 : vector<32x128xf32>
    %cst_11 = arith.constant dense<0.000000e+00> : vector<32xf32>
    %18 = vector.multi_reduction <add>, %17, %cst_11 [1] : vector<32x128xf32> to vector<32xf32>
    %19 = vector.shape_cast %18 : vector<32xf32> to vector<32x1xf32>
    %cst_12 = arith.constant 1.280000e+02 : f32
    %20 = vector.broadcast %cst_12 : f32 to vector<32x1xf32>
    %21 = arith.divf %19, %20 : vector<32x1xf32>
    %22 = arith.mulf %16, %16 : vector<32x1xf32>
    %23 = arith.subf %21, %22 : vector<32x1xf32>
    %c0_13 = arith.constant 0 : index
    %c1 = arith.constant 1 : index
    %24 = vector.load %arg3[%c0_13, %c1] : memref<48x8xf32, #tpu.memory_space<vmem>>, vector<32x1xf32>
    %c0_14 = arith.constant 0 : index
    %c2 = arith.constant 2 : index
    %25 = vector.load %arg3[%c0_14, %c2] : memref<48x8xf32, #tpu.memory_space<vmem>>, vector<32x1xf32>
    %cst_15 = arith.constant 9.99999974E-6 : f32
    %26 = vector.broadcast %cst_15 : f32 to vector<32x1xf32>
    %27 = arith.addf %23, %26 : vector<32x1xf32>
    %28 = math.rsqrt %27 : vector<32x1xf32>
    %29 = arith.mulf %24, %28 : vector<32x1xf32>
    %30 = arith.mulf %16, %29 : vector<32x1xf32>
    %31 = arith.subf %25, %30 : vector<32x1xf32>
    %32 = vector.broadcast %29 : vector<32x1xf32> to vector<32x128xf32>
    %33 = arith.mulf %12, %32 : vector<32x128xf32>
    %34 = vector.broadcast %31 : vector<32x1xf32> to vector<32x128xf32>
    %35 = arith.addf %33, %34 : vector<32x128xf32>
    %cst_16 = arith.constant 0.000000e+00 : f32
    %36 = vector.broadcast %cst_16 : f32 to vector<32x128xf32>
    %37 = arith.cmpf ogt, %35, %36 : vector<32x128xf32>
    %cst_17 = arith.constant 0.00999999977 : f32
    %38 = vector.broadcast %cst_17 : f32 to vector<32x128xf32>
    %39 = arith.mulf %38, %35 : vector<32x128xf32>
    %40 = arith.select %37, %35, %39 : vector<32x128xi1>, vector<32x128xf32>
    %c64 = arith.constant 64 : index
    %c0_18 = arith.constant 0 : index
    %41 = vector.load %arg2[%c64, %c0_18] : memref<168x48xf32, #tpu.memory_space<vmem>>, vector<32x32xf32>
    %cst_19 = arith.constant dense<0.000000e+00> : vector<32x128xf32>
    %42 = tpu.matmul %41, %40, %cst_19 {dimension_numbers = #tpu.dot_dimension_numbers<[1], [0], [0], [1], [0, 0, 1, 1], [], []>} : vector<32x32xf32>, vector<32x128xf32>, vector<32x128xf32> -> vector<32x128xf32>
    %cst_20 = arith.constant dense<0.000000e+00> : vector<32xf32>
    %43 = vector.multi_reduction <add>, %42, %cst_20 [1] : vector<32x128xf32> to vector<32xf32>
    %44 = vector.shape_cast %43 : vector<32xf32> to vector<32x1xf32>
    %cst_21 = arith.constant 1.280000e+02 : f32
    %45 = vector.broadcast %cst_21 : f32 to vector<32x1xf32>
    %46 = arith.divf %44, %45 : vector<32x1xf32>
    %47 = arith.mulf %42, %42 : vector<32x128xf32>
    %cst_22 = arith.constant dense<0.000000e+00> : vector<32xf32>
    %48 = vector.multi_reduction <add>, %47, %cst_22 [1] : vector<32x128xf32> to vector<32xf32>
    %49 = vector.shape_cast %48 : vector<32xf32> to vector<32x1xf32>
    %cst_23 = arith.constant 1.280000e+02 : f32
    %50 = vector.broadcast %cst_23 : f32 to vector<32x1xf32>
    %51 = arith.divf %49, %50 : vector<32x1xf32>
    %52 = arith.mulf %46, %46 : vector<32x1xf32>
    %53 = arith.subf %51, %52 : vector<32x1xf32>
    %c0_24 = arith.constant 0 : index
    %c3 = arith.constant 3 : index
    %54 = vector.load %arg3[%c0_24, %c3] : memref<48x8xf32, #tpu.memory_space<vmem>>, vector<32x1xf32>
    %c0_25 = arith.constant 0 : index
    %c4 = arith.constant 4 : index
    %55 = vector.load %arg3[%c0_25, %c4] : memref<48x8xf32, #tpu.memory_space<vmem>>, vector<32x1xf32>
    %cst_26 = arith.constant 9.99999974E-6 : f32
    %56 = vector.broadcast %cst_26 : f32 to vector<32x1xf32>
    %57 = arith.addf %53, %56 : vector<32x1xf32>
    %58 = math.rsqrt %57 : vector<32x1xf32>
    %59 = arith.mulf %54, %58 : vector<32x1xf32>
    %60 = arith.mulf %46, %59 : vector<32x1xf32>
    %61 = arith.subf %55, %60 : vector<32x1xf32>
    %62 = vector.broadcast %59 : vector<32x1xf32> to vector<32x128xf32>
    %63 = arith.mulf %42, %62 : vector<32x128xf32>
    %64 = vector.broadcast %61 : vector<32x1xf32> to vector<32x128xf32>
    %65 = arith.addf %63, %64 : vector<32x128xf32>
    %cst_27 = arith.constant 0.000000e+00 : f32
    %66 = vector.broadcast %cst_27 : f32 to vector<32x128xf32>
    %67 = arith.cmpf ogt, %65, %66 : vector<32x128xf32>
    %cst_28 = arith.constant 0.00999999977 : f32
    %68 = vector.broadcast %cst_28 : f32 to vector<32x128xf32>
    %69 = arith.mulf %68, %65 : vector<32x128xf32>
    %70 = arith.select %67, %65, %69 : vector<32x128xi1>, vector<32x128xf32>
    %c96 = arith.constant 96 : index
    %c0_29 = arith.constant 0 : index
    %71 = vector.load %arg2[%c96, %c0_29] : memref<168x48xf32, #tpu.memory_space<vmem>>, vector<48x32xf32>
    %cst_30 = arith.constant dense<0.000000e+00> : vector<48x128xf32>
    %72 = tpu.matmul %71, %70, %cst_30 {dimension_numbers = #tpu.dot_dimension_numbers<[1], [0], [0], [1], [0, 0, 1, 1], [], []>} : vector<48x32xf32>, vector<32x128xf32>, vector<48x128xf32> -> vector<48x128xf32>
    %c0_31 = arith.constant 0 : index
    %c5 = arith.constant 5 : index
    %73 = vector.load %arg3[%c0_31, %c5] : memref<48x8xf32, #tpu.memory_space<vmem>>, vector<48x1xf32>
    %74 = vector.broadcast %73 : vector<48x1xf32> to vector<48x128xf32>
    %75 = arith.addf %72, %74 : vector<48x128xf32>
    %cst_32 = arith.constant 0.000000e+00 : f32
    %76 = vector.broadcast %cst_32 : f32 to vector<48x128xf32>
    %77 = arith.cmpf ogt, %75, %76 : vector<48x128xf32>
    %cst_33 = arith.constant 0.00999999977 : f32
    %78 = vector.broadcast %cst_33 : f32 to vector<48x128xf32>
    %79 = arith.mulf %78, %75 : vector<48x128xf32>
    %80 = arith.select %77, %75, %79 : vector<48x128xi1>, vector<48x128xf32>
    %c144 = arith.constant 144 : index
    %c0_34 = arith.constant 0 : index
    %81 = vector.load %arg2[%c144, %c0_34] : memref<168x48xf32, #tpu.memory_space<vmem>>, vector<16x48xf32>
    %cst_35 = arith.constant dense<0.000000e+00> : vector<16x128xf32>
    %82 = tpu.matmul %81, %80, %cst_35 {dimension_numbers = #tpu.dot_dimension_numbers<[1], [0], [0], [1], [0, 0, 1, 1], [], []>} : vector<16x48xf32>, vector<48x128xf32>, vector<16x128xf32> -> vector<16x128xf32>
    %c0_36 = arith.constant 0 : index
    %c6 = arith.constant 6 : index
    %83 = vector.load %arg3[%c0_36, %c6] : memref<48x8xf32, #tpu.memory_space<vmem>>, vector<16x1xf32>
    %84 = vector.broadcast %83 : vector<16x1xf32> to vector<16x128xf32>
    %85 = arith.addf %82, %84 : vector<16x128xf32>
    %cst_37 = arith.constant 0.000000e+00 : f32
    %86 = vector.broadcast %cst_37 : f32 to vector<16x128xf32>
    %87 = arith.cmpf ogt, %85, %86 : vector<16x128xf32>
    %cst_38 = arith.constant 0.00999999977 : f32
    %88 = vector.broadcast %cst_38 : f32 to vector<16x128xf32>
    %89 = arith.mulf %88, %85 : vector<16x128xf32>
    %90 = arith.select %87, %85, %89 : vector<16x128xi1>, vector<16x128xf32>
    %c160 = arith.constant 160 : index
    %c0_39 = arith.constant 0 : index
    %91 = vector.load %arg2[%c160, %c0_39] : memref<168x48xf32, #tpu.memory_space<vmem>>, vector<8x16xf32>
    %cst_40 = arith.constant dense<0.000000e+00> : vector<8x128xf32>
    %92 = tpu.matmul %91, %90, %cst_40 {dimension_numbers = #tpu.dot_dimension_numbers<[1], [0], [0], [1], [0, 0, 1, 1], [], []>} : vector<8x16xf32>, vector<16x128xf32>, vector<8x128xf32> -> vector<8x128xf32>
    %c0_41 = arith.constant 0 : index
    %c7 = arith.constant 7 : index
    %93 = vector.load %arg3[%c0_41, %c7] : memref<48x8xf32, #tpu.memory_space<vmem>>, vector<8x1xf32>
    %94 = vector.broadcast %93 : vector<8x1xf32> to vector<8x128xf32>
    %95 = arith.addf %92, %94 : vector<8x128xf32>
    %cst_42 = arith.constant 0.000000e+00 : f32
    %96 = vector.broadcast %cst_42 : f32 to vector<8x128xf32>
    %97 = arith.cmpf ogt, %95, %96 : vector<8x128xf32>
    %cst_43 = arith.constant 0.00999999977 : f32
    %98 = vector.broadcast %cst_43 : f32 to vector<8x128xf32>
    %99 = arith.mulf %98, %95 : vector<8x128xf32>
    %100 = arith.select %97, %95, %99 : vector<8x128xi1>, vector<8x128xf32>
    %c0_44 = arith.constant 0 : index
    %c0_45 = arith.constant 0 : index
    %101 = vector.load %arg4[%c0_44, %c0_45] : memref<8x128xf32, #tpu.memory_space<vmem>>, vector<8x128xf32>
    tpu.vector_store %arg4[%c0_44, %c0_45], %100 {strides = array<i32>} : memref<8x128xf32, #tpu.memory_space<vmem>>, vector<8x128xf32>,
    return
  }
  func.func @transform_0(%arg0: i32) -> (i32, i32) {
    %c0_i32 = arith.constant 0 : i32
    %c0_i32_0 = arith.constant 0 : i32
    %c0_i32_1 = arith.constant 0 : i32
    return %c0_i32, %c0_i32_0 : i32, i32
  }
  func.func @transform_1(%arg0: i32) -> (i32, i32) {
    %c0_i32 = arith.constant 0 : i32
    %c0_i32_0 = arith.constant 0 : i32
    %c0_i32_1 = arith.constant 0 : i32
    return %c0_i32, %c0_i32_0 : i32, i32
  }
  func.func @transform_2(%arg0: i32) -> (i32, i32) {
    %c0_i32 = arith.constant 0 : i32
    %c0_i32_0 = arith.constant 0 : i32
    %c0_i32_1 = arith.constant 0 : i32
    return %c0_i32, %c0_i32_0 : i32, i32
  }
  func.func @transform_3(%arg0: i32) -> (i32, i32) {
    %c0_i32 = arith.constant 0 : i32
    %c0_i32_0 = arith.constant 0 : i32
    %c0_i32_1 = arith.constant 0 : i32
    return %c0_i32, %c0_i32_0 : i32, i32
  }
}

</mosaic_0001>

<bundles_post_ra>
// kernel: fwd.1
= control target key start
LH: loop header
LB: loop body
LE: loop exit
PB: predicated region body
PF: predicated region fallthrough
CT: control target
= control target key end

     0   :  { %8 = vsyncpa [#allocation3], 0  ;;  %s1544_s0 = inlined_call_operand.hbm [shape: f32[12,128], index: 0, kind: input, shape index: {}]   ;;  %s1545_s1 = inlined_call_operand.hbm [shape: f32[168,48], index: 1, kind: input, shape index: {}]   ;;  %s1546_s2 = inlined_call_operand.hbm [shape: f32[48,8], index: 2, kind: input, shape index: {}]   ;;  %s1547_s3 = inlined_call_operand.vmem [shape: f32[8,128], index: 3, kind: output, shape index: {}]  }
   0x1   :  { %9 = vsyncpa [#allocation5], 0  ;;  %s1340_s12 = smov [#allocation4]   ;;  %s1341_s14 = smov [#allocation2]  }
   0x2   :  { %s27_s13 = sshll.u32 %s1340_s12, 4  ;;  %s15_s15 = sshll.u32 %s1341_s14, 4  ;;  %s28_s13 = int_to_ptr.vmem [resolvable:$true] %s27_s13  ;;  %s1378_s15 = int_to_ptr.vmem [resolvable:$true] %s15_s15 }
   0x3   :  { %s1270_s18 = scalar_lea.hbm %s1545_s1, 2688 }
   0x4   :  { %p1271_p0 = scmp.ne.s32.totalorder %s1545_s1, %s1270_s18  ;;  %p1274_p1 = scmp.lt.u32.totalorder %s1270_s18, %s1545_s1 }
   0x6   :  { %p1276_p2 = pnand %p1274_p1, %p1271_p0 }
   0x8   :  { %1279 = shalt.err (!%p1276_p2)
}
   0x9   :  { %s1280_s23 = scalar_lea.vmem %s28_s13, 2688  ;;  %p1285_p4 = scmp.lt.s32.totalorder %s28_s13, %s28_s13 }
   0xa   :  { %p1281_p3 = scmp.ne.s32.totalorder %s28_s13, %s1280_s23  ;;  %p1286_p5 = scmp.lt.s32.totalorder %s1280_s23, %s1280_s23 }
   0xc   :  { %p1287_p6 = por %p1286_p5, %p1285_p4 }
   0xe   :  { %p1288_p7 = pnand %p1287_p6, %p1281_p3 }
  0x10   :  { %1291 = shalt.err (!%p1288_p7)
}
  0x11   :  { %s1342_s24 = smov 128   ;;  %s1343_s25 = smov 8  }
  0x12   :  { %33 = dma.hbm_to_vmem [thread:$0]  %s1545_s1, 2688, %s28_s13, [#allocation5], %s1342_s24, %s1342_s24, %s1343_s25  }
  0x13   :  { %s1292_s30 = scalar_lea.hbm %s1544_s0, 256 }
  0x14   :  { %p1293_p8 = scmp.ne.s32.totalorder %s1544_s0, %s1292_s30  ;;  %p1296_p9 = scmp.lt.u32.totalorder %s1292_s30, %s1544_s0 }
  0x16   :  { %p1298_p10 = pnand %p1296_p9, %p1293_p8 }
  0x18   :  { %1301 = shalt.err (!%p1298_p10)
}
  0x19   :  { %s1302_s8 = scalar_lea.vmem %s1378_s15, 256  ;;  %p1307_p12 = scmp.lt.s32.totalorder %s1378_s15, %s1378_s15 }
  0x1a   :  { %p1303_p11 = scmp.ne.s32.totalorder %s1378_s15, %s1302_s8  ;;  %p1308_p13 = scmp.lt.s32.totalorder %s1302_s8, %s1302_s8 }
  0x1c   :  { %p1309_p0 = por %p1308_p13, %p1307_p12 }
  0x1e   :  { %p1310_p1 = pnand %p1309_p0, %p1303_p11 }
  0x20   :  { %1313 = shalt.err (!%p1310_p1)
}
  0x21   :  { %21 = dma.hbm_to_vmem [thread:$0]  %s1544_s0, 256, %s1378_s15, [#allocation3], %s1342_s24, %s1342_s24, %s1343_s25  }
  0x22   :  { %s1344_s10 = smov [#allocation6]   ;;  %s1314_s14 = scalar_lea.hbm %s1546_s2, 768 }
  0x23   :  { %s39_s11 = sshll.u32 %s1344_s10, 4  ;;  %p1315_p2 = scmp.ne.s32.totalorder %s1546_s2, %s1314_s14  ;;  %s40_s11 = int_to_ptr.vmem [resolvable:$true] %s39_s11 }
  0x24   :  { %p1318_p3 = scmp.lt.u32.totalorder %s1314_s14, %s1546_s2 }
  0x26   :  { %p1320_p4 = pnand %p1318_p3, %p1315_p2 }
  0x28   :  { %1323 = shalt.err (!%p1320_p4)
}
  0x29   :  { %s1324_s20 = scalar_lea.vmem %s40_s11, 768  ;;  %p1329_p6 = scmp.lt.s32.totalorder %s40_s11, %s40_s11 }
  0x2a   :  { %p1325_p5 = scmp.ne.s32.totalorder %s40_s11, %s1324_s20  ;;  %p1330_p7 = scmp.lt.s32.totalorder %s1324_s20, %s1324_s20 }
  0x2c   :  { %p1331_p8 = por %p1330_p7, %p1329_p6 }
  0x2e   :  { %p1332_p9 = pnand %p1331_p8, %p1325_p5 }
  0x30   :  { %1335 = shalt.err (!%p1332_p9)
}
  0x31   :  { %45 = dma.hbm_to_vmem [thread:$0]  %s1546_s2, 768, %s40_s11, [#allocation5], %s1342_s24, %s1342_s24, %s1343_s25  }
  0x32   :  { %1336 = dma.done.wait [#allocation3], 256  }
  0x33   :  { %1337 = vsyncadd [#allocation3], 4294967040 }
  0x34   :  { %1338 = dma.done.wait [#allocation5], 3456  }
  0x35   :  { %1339 = vsyncadd [#allocation5], 4294963840  ;;  %v1345_v0 = vmov 0   ;;  %vm98_vm0 = vcmask 1043456   ;;  %vm85_vm1 = vcmask 97280   ;;  %vm1346_vm2 = vmmov 1  }
  0x36   :  { %1238 = vset.pattern.permute.xlu0 %v1345_v0  ;;  %1239 = vset.pattern.permute.xlu1 %v1345_v0  ;;  %vm1176_vm3 = vmpackc.low %vm98_vm0, %vm1346_vm2  ;;  %v55_v1 = vld [vmem:[#allocation2] sm:$0xff]  ;;  %v56_v2 = vld [vmem:[#allocation2 + $0x8] sm:$0xf]  ;;  %vm203_vm4 = vcmask 261120   ;;  %v1347_v46 = vmov 1   ;;  %s1348_s2 = smov 1  }
  0x37   :  { %v57_v3 = vld [vmem:[#allocation4] sm:$0xff]  ;;  %v1175_v4 = vpack.c.bf16 %v56_v2, %v55_v1  ;;  %v1431_v5 = vld [vmem:[#allocation6] sm:$0xff]  ;;  %v1433_v6 = vld [vmem:[#allocation6 + $0x10] sm:$0xff] }
  0x38   :  { %1102 = vmatprep.mubr.msk.f32.mxu0 %vm85_vm1, %v57_v3  ;;  %67 = vperm.xlu0 %1238, %v1431_v5   ;;  %v58_v7 = vld [vmem:[#allocation4 + $0x8] sm:$0xff]  ;;  %v1437_v8 = vld [vmem:[#allocation6 + $0x8] sm:$0xff]  ;;  %v1439_v10 = vld [vmem:[#allocation6 + $0x18] sm:$0xff] }
  0x39   :  { %1177 = vmatprep.subr.msk.bf16.mxu0 %vm1176_vm3, %v1175_v4  ;;  %77 = vperm.xlu1 %1239, %v1433_v6   ;;  %v59_v9 = vld [vmem:[#allocation4 + $0x10] sm:$0xff]  ;;  %v60_v11 = vld [vmem:[#allocation4 + $0x18] sm:$0xff]  ;;  %v199_v12 = vld [vmem:[#allocation4 + $0x20] sm:$0xff] }
  0x3a   :  { %1180 = vmatpush3.bf16.msk.msra.mxu0 %vm1176_vm3, %v1175_v4  ;;  %1116 = vmatprep.mubr.msk.f32.mxu1 %vm203_vm4, %v199_v12  ;;  %v200_v35 = vld [vmem:[#allocation4 + $0x28] sm:$0xff]  ;;  %v201_v36 = vld [vmem:[#allocation4 + $0x30] sm:$0xff]  ;;  %v202_v37 = vld [vmem:[#allocation4 + $0x38] sm:$0xff] }
  0x3c   :  { %72 = vperm.xlu0 %1238, %v1437_v8  }
  0x3d   :  { %1103 = vmatmul.mubr.msk.f32.vlgmr.msra.gmra.mrb[0].mxu0 %vm85_vm1, %v58_v7  ;;  %82 = vperm.xlu1 %1239, %v1439_v10  }
  0x3e   :  { %1105 = vmatprep.mubr.msk.f32.mxu0 %vm85_vm1, %v59_v9 }
  0x40   :  { %1240 = vset.pattern.permute.xlu0 %v1347_v46 }
  0x41   :  { %1106 = vmatmul.mubr.msk.f32.gmra.mrb[2].mxu0 %vm85_vm1, %v60_v11  ;;  %1241 = vset.pattern.permute.xlu1 %v1347_v46  ;;  %vm854_vm1 = vcmask 392192  }
  0xb7   :  { %v68_v13 = vpop.permute.xlu0 %67 }
  0xb8   :  { %v78_v14 = vpop.permute.xlu1 %77 }
  0xbb   :  { %v73_v15 = vpop.permute.xlu0 %72 }
  0xbc   :  { %v83_v21 = vpop.permute.xlu1 %82 }
 0x110   :  { %v1104_v16 = vpop.f32.mrb[0].mxu0 }
 0x111   :  { %v174_v17 = vadd.f32 %v1104_v16, %v73_v15  ;;  %v168_v18 = vpop.f32.mrb[1].mxu0 }
 0x112   :  { %v169_v19 = vadd.f32 %v168_v18, %v68_v13 }
 0x113   :  { %v192_v20 = vmul.f32 0.01, %v174_v17  ;;  %vm188_vm5 = vcmp.gt.f32.partialorder %v174_v17, 0.0 }
 0x114   :  { %v191_v22 = vmul.f32 0.01, %v169_v19  ;;  %v1107_v23 = vpop.f32.mrb[2].mxu0  ;;  %vm187_vm6 = vcmp.gt.f32.partialorder %v169_v19, 0.0 }
 0x115   :  { %v184_v24 = vadd.f32 %v1107_v23, %v83_v21  ;;  %v178_v25 = vpop.f32.mrb[3].mxu0  ;;  %v196_v26 = vsel %vm188_vm5, %v174_v17, %v192_v20 }
 0x116   :  { %v179_v27 = vadd.f32 %v178_v25, %v78_v14  ;;  %v195_v28 = vsel %vm187_vm6, %v169_v19, %v191_v22 }
 0x117   :  { %vm190_vm7 = vcmp.gt.f32.partialorder %v184_v24, 0.0  ;;  %v194_v29 = vmul.f32 0.01, %v184_v24  ;;  %v1181_v30 = vpack.c.bf16 %v196_v26, %v195_v28  ;;  %v1349_v26 = vmov 2  }
 0x118   :  { %vm189_vm8 = vcmp.gt.f32.partialorder %v179_v27, 0.0  ;;  %v193_v31 = vmul.f32 0.01, %v179_v27 }
 0x119   :  { %1182 = vmatprep.subr.bf16.mxu1 %v1181_v30  ;;  %v198_v32 = vsel %vm190_vm7, %v184_v24, %v194_v29 }
 0x11a   :  { %1184 = vmatpush3.bf16.msra.mxu1 %v1181_v30  ;;  %v197_v33 = vsel %vm189_vm8, %v179_v27, %v193_v31  ;;  %vm1355_vm8 = vmmov 0  }
 0x11b   :  { %v1185_v34 = vpack.c.bf16 %v198_v32, %v197_v33 }
 0x11d   :  { %1186 = vmatprep.subr.bf16.mxu1 %v1185_v34 }
 0x11e   :  { %1188 = vmatpush3.bf16.msra.mxu1 %v1185_v34 }
 0x121   :  { %1117 = vmatmul.mubr.msk.f32.vlgmr.msra.gmra.mrb[0].mxu1 %vm203_vm4, %v200_v35 }
 0x122   :  { %1119 = vmatprep.mubr.msk.f32.mxu1 %vm203_vm4, %v201_v36  ;;  %v434_v36 = vld [vmem:[#allocation4 + $0x40] sm:$0xff] }
 0x123   :  { %1130 = vmatprep.mubr.msk.f32.mxu0 %vm203_vm4, %v434_v36 }
 0x125   :  { %1120 = vmatmul.mubr.msk.f32.gmra.mrb[2].mxu1 %vm203_vm4, %v202_v37 }
 0x1f4   :  { %v1450_v38 = vpop.f32.mrb[0].mxu1 }
 0x1f5   :  { %303 = vadd.xlane.f32.xlu1 %v1450_v38  ;;  %v1453_v39 = vpop.f32.mrb[1].mxu1  ;;  %v315_v41 = vmul.f32 %v1450_v38, %v1450_v38 }
 0x1f6   :  { %301 = vadd.xlane.f32.xlu0 %v1453_v39  ;;  %v314_v44 = vmul.f32 %v1453_v39, %v1453_v39 }
 0x1f8   :  { %v1456_v40 = vpop.f32.mrb[2].mxu1 }
 0x1f9   :  { %v1460_v42 = vpop.f32.mrb[3].mxu1  ;;  %v317_v45 = vmul.f32 %v1456_v40, %v1456_v40 }
 0x1fa   :  { %320 = vadd.xlane.f32.xlu0 %v315_v41  ;;  %305 = vadd.xlane.f32.xlu1 %v1460_v42  ;;  %v316_v43 = vmul.f32 %v1460_v42, %v1460_v42 }
 0x1fe   :  { %318 = vadd.xlane.f32.xlu0 %v314_v44  ;;  %322 = vadd.xlane.f32.xlu1 %v316_v43 }
 0x202   :  { %307 = vadd.xlane.f32.xlu0 %v1456_v40 }
 0x206   :  { %324 = vadd.xlane.f32.xlu0 %v317_v45 }
 0x282   :  { %v304_v47 = vpop.xlane.xlu1 %303 }
 0x283   :  { %v302_v48 = vpop.xlane.xlu0 %301  ;;  %v311_v49 = vmul.f32 0.0078125, %v304_v47 }
 0x284   :  { %v310_v53 = vmul.f32 0.0078125, %v302_v48 }
 0x285   :  { %v331_v52 = vmul.f32 %v311_v49, %v311_v49 }
 0x286   :  { %v330_v60 = vmul.f32 %v310_v53, %v310_v53 }
 0x287   :  { %v321_v50 = vpop.xlane.xlu0 %320  ;;  %v306_v51 = vpop.xlane.xlu1 %305 }
 0x288   :  { %v327_v54 = vmul.f32 0.0078125, %v321_v50  ;;  %v312_v55 = vmul.f32 0.0078125, %v306_v51 }
 0x28a   :  { %v335_v56 = vsub.f32 %v327_v54, %v331_v52  ;;  %v332_v57 = vmul.f32 %v312_v55, %v312_v55 }
 0x28b   :  { %v319_v58 = vpop.xlane.xlu0 %318  ;;  %v323_v59 = vpop.xlane.xlu1 %322 }
 0x28c   :  { %v339_v61 = vadd.f32 1e-05, %v335_v56  ;;  %v326_v62 = vmul.f32 0.0078125, %v319_v58  ;;  %v328_v63 = vmul.f32 0.0078125, %v323_v59 }
 0x28e   :  { %1254 = vrsqrt.f32 %v339_v61  ;;  %v334_v0 = vsub.f32 %v326_v62, %v330_v60  ;;  %v336_v1 = vsub.f32 %v328_v63, %v332_v57 }
 0x28f   :  { %v308_v2 = vpop.xlane.xlu0 %307 }
 0x290   :  { %v338_v3 = vadd.f32 1e-05, %v334_v0  ;;  %v340_v4 = vadd.f32 1e-05, %v336_v1  ;;  %v313_v7 = vmul.f32 0.0078125, %v308_v2  ;;  %v435_v0 = vld [vmem:[#allocation4 + $0x48] sm:$0xff] }
 0x291   :  { %v436_v1 = vld [vmem:[#allocation4 + $0x50] sm:$0xff] }
 0x292   :  { %1256 = vrsqrt.f32 %v338_v3  ;;  %v333_v11 = vmul.f32 %v313_v7, %v313_v7 }
 0x293   :  { %1258 = vrsqrt.f32 %v340_v4  ;;  %v325_v9 = vpop.xlane.xlu0 %324 }
 0x294   :  { %v329_v12 = vmul.f32 0.0078125, %v325_v9 }
 0x296   :  { %v337_v13 = vsub.f32 %v329_v12, %v333_v11 }
 0x298   :  { %v1255_v14 = vpop.eup %1254  ;;  %v341_v15 = vadd.f32 1e-05, %v337_v13 }
 0x299   :  { %v347_v16 = vmul.f32 %v1255_v14, %v1437_v8  ;;  %v1350_v14 = vmov 3  }
 0x29a   :  { %1260 = vrsqrt.f32 %v341_v15 }
 0x29b   :  { %v351_v17 = vmul.f32 %v347_v16, %v311_v49 }
 0x29c   :  { %v1257_v18 = vpop.eup %1256 }
 0x29d   :  { %v1259_v19 = vpop.eup %1258  ;;  %360 = vrot.lane.b32.xlu0 %v351_v17, %s1348_s2  ;;  %v346_v20 = vmul.f32 %v1257_v18, %v1431_v5 }
 0x29e   :  { %v348_v22 = vmul.f32 %v1259_v19, %v1433_v6 }
 0x29f   :  { %v350_v21 = vmul.f32 %v346_v20, %v310_v53 }
 0x2a0   :  { %v352_v23 = vmul.f32 %v348_v22, %v312_v55 }
 0x2a1   :  { %376 = vperm.xlu0 %1240, %v346_v20   ;;  %358 = vrot.lane.b32.xlu1 %v350_v21, %s1348_s2 }
 0x2a4   :  { %v1261_v24 = vpop.eup %1260 }
 0x2a5   :  { %362 = vrot.lane.b32.xlu1 %v352_v23, %s1348_s2  ;;  %v349_v25 = vmul.f32 %v1261_v24, %v1439_v10  ;;  %1242 = vset.pattern.permute.xlu0 %v1349_v26 }
 0x2a7   :  { %v353_v27 = vmul.f32 %v349_v25, %v313_v7 }
 0x2a9   :  { %364 = vrot.lane.b32.xlu1 %v353_v27, %s1348_s2 }
 0x2ad   :  { %381 = vperm.xlu1 %1241, %v347_v16  }
 0x2b1   :  { %386 = vperm.xlu1 %1241, %v348_v22  }
 0x2b5   :  { %391 = vperm.xlu1 %1241, %v349_v25  }
 0x2b9   :  { %1243 = vset.pattern.permute.xlu1 %v1349_v26 }
 0x30f   :  { %v361_v28 = vpop.permute.xlu0 %360 }
 0x310   :  { %v371_v29 = vsub.f32 %v1437_v8, %v361_v28 }
 0x312   :  { %405 = vperm.xlu0 %1242, %v371_v29  }
 0x313   :  { %v359_v30 = vpop.permute.xlu1 %358 }
 0x314   :  { %v370_v31 = vsub.f32 %v1431_v5, %v359_v30 }
 0x316   :  { %400 = vperm.xlu1 %1243, %v370_v31  }
 0x317   :  { %v363_v32 = vpop.permute.xlu1 %362 }
 0x318   :  { %v372_v33 = vsub.f32 %v1433_v6, %v363_v32 }
 0x31a   :  { %410 = vperm.xlu0 %1242, %v372_v33  }
 0x31b   :  { %v365_v34 = vpop.permute.xlu1 %364 }
 0x31c   :  { %v373_v35 = vsub.f32 %v1439_v10, %v365_v34 }
 0x31e   :  { %415 = vperm.xlu1 %1243, %v373_v35   ;;  %1244 = vset.pattern.permute.xlu0 %v1350_v14 }
 0x320   :  { %v377_v43 = vpop.permute.xlu0 %376 }
 0x321   :  { %v394_v48 = vmul.f32 %v377_v43, %v1453_v39 }
 0x322   :  { %1245 = vset.pattern.permute.xlu1 %v1350_v14 }
 0x32c   :  { %v382_v37 = vpop.permute.xlu1 %381 }
 0x32d   :  { %v395_v44 = vmul.f32 %v1450_v38, %v382_v37 }
 0x330   :  { %v387_v41 = vpop.permute.xlu1 %386 }
 0x331   :  { %v396_v52 = vmul.f32 %v387_v41, %v1460_v42 }
 0x334   :  { %v392_v45 = vpop.permute.xlu1 %391 }
 0x335   :  { %v397_v38 = vmul.f32 %v1456_v40, %v392_v45  ;;  %v437_v40 = vld [vmem:[#allocation4 + $0x58] sm:$0xff] }
 0x391   :  { %v406_v46 = vpop.permute.xlu0 %405 }
 0x392   :  { %v419_v47 = vadd.f32 %v406_v46, %v395_v44 }
 0x394   :  { %v427_v50 = vmul.f32 0.01, %v419_v47  ;;  %vm423_vm9 = vcmp.gt.f32.partialorder %v419_v47, 0.0 }
 0x395   :  { %v401_v49 = vpop.permute.xlu1 %400 }
 0x396   :  { %v418_v51 = vadd.f32 %v401_v49, %v394_v48  ;;  %v431_v57 = vsel %vm423_vm9, %v419_v47, %v427_v50 }
 0x398   :  { %vm422_vm10 = vcmp.gt.f32.partialorder %v418_v51, 0.0  ;;  %v426_v53 = vmul.f32 0.01, %v418_v51 }
 0x399   :  { %v411_v54 = vpop.permute.xlu0 %410 }
 0x39a   :  { %v420_v55 = vadd.f32 %v411_v54, %v396_v52  ;;  %v430_v56 = vsel %vm422_vm10, %v418_v51, %v426_v53 }
 0x39b   :  { %v1189_v58 = vpack.c.bf16 %v431_v57, %v430_v56 }
 0x39c   :  { %v428_v60 = vmul.f32 0.01, %v420_v55  ;;  %vm424_vm11 = vcmp.gt.f32.partialorder %v420_v55, 0.0 }
 0x39d   :  { %1190 = vmatprep.subr.bf16.mxu0 %v1189_v58  ;;  %v416_v59 = vpop.permute.xlu1 %415 }
 0x39e   :  { %v421_v61 = vadd.f32 %v416_v59, %v397_v38  ;;  %1192 = vmatpush3.bf16.msra.mxu0 %v1189_v58  ;;  %v432_v62 = vsel %vm424_vm11, %v420_v55, %v428_v60  ;;  %v1351_v58 = vmov 4   ;;  %vm949_vm11 = vcmask 130048  }
 0x3a0   :  { %vm425_vm12 = vcmp.gt.f32.partialorder %v421_v61, 0.0  ;;  %v429_v39 = vmul.f32 0.01, %v421_v61 }
 0x3a2   :  { %v433_v63 = vsel %vm425_vm12, %v421_v61, %v429_v39 }
 0x3a3   :  { %v1193_v42 = vpack.c.bf16 %v433_v63, %v432_v62 }
 0x3a5   :  { %1194 = vmatprep.subr.bf16.mxu0 %v1193_v42 }
 0x3a6   :  { %1196 = vmatpush3.bf16.msra.mxu0 %v1193_v42 }
 0x3a9   :  { %1131 = vmatmul.mubr.msk.f32.vlgmr.msra.gmra.mrb[4].mxu0 %vm203_vm4, %v435_v0 }
 0x3aa   :  { %1133 = vmatprep.mubr.msk.f32.mxu0 %vm203_vm4, %v436_v1  ;;  %v667_v1 = vld [vmem:[#allocation4 + $0x60] sm:$0xff] }
 0x3ab   :  { %1144 = vmatprep.mubr.msk.f32.mxu1 %vm203_vm4, %v667_v1 }
 0x3ad   :  { %1134 = vmatmul.mubr.msk.f32.gmra.mrb[6].mxu0 %vm203_vm4, %v437_v40  ;;  %v1352_v40 = vmov 5  }
 0x47c   :  { %v1490_v2 = vpop.f32.mrb[4].mxu0 }
 0x47d   :  { %537 = vadd.xlane.f32.xlu1 %v1490_v2  ;;  %v1493_v3 = vpop.f32.mrb[5].mxu0  ;;  %v548_v7 = vmul.f32 %v1490_v2, %v1490_v2 }
 0x47e   :  { %535 = vadd.xlane.f32.xlu0 %v1493_v3  ;;  %v547_v12 = vmul.f32 %v1493_v3, %v1493_v3 }
 0x480   :  { %v1496_v4 = vpop.f32.mrb[6].mxu0 }
 0x481   :  { %v1500_v9 = vpop.f32.mrb[7].mxu0  ;;  %v550_v13 = vmul.f32 %v1496_v4, %v1496_v4 }
 0x482   :  { %553 = vadd.xlane.f32.xlu0 %v548_v7  ;;  %539 = vadd.xlane.f32.xlu1 %v1500_v9  ;;  %v549_v11 = vmul.f32 %v1500_v9, %v1500_v9  ;;  %v678_v7 = vld [vmem:[#allocation6 + $0x28] sm:$0xff] }
 0x486   :  { %551 = vadd.xlane.f32.xlu0 %v547_v12  ;;  %555 = vadd.xlane.f32.xlu1 %v549_v11  ;;  %v677_v11 = vld [vmem:[#allocation6 + $0x20] sm:$0xff] }
 0x48a   :  { %541 = vadd.xlane.f32.xlu0 %v1496_v4 }
 0x48e   :  { %557 = vadd.xlane.f32.xlu0 %v550_v13 }
 0x50a   :  { %v538_v15 = vpop.xlane.xlu1 %537 }
 0x50b   :  { %v536_v16 = vpop.xlane.xlu0 %535  ;;  %v544_v17 = vmul.f32 0.0078125, %v538_v15 }
 0x50c   :  { %v543_v21 = vmul.f32 0.0078125, %v536_v16 }
 0x50d   :  { %v564_v20 = vmul.f32 %v544_v17, %v544_v17 }
 0x50e   :  { %v563_v28 = vmul.f32 %v543_v21, %v543_v21 }
 0x50f   :  { %v554_v18 = vpop.xlane.xlu0 %553  ;;  %v540_v19 = vpop.xlane.xlu1 %539 }
 0x510   :  { %v560_v22 = vmul.f32 0.0078125, %v554_v18  ;;  %v545_v23 = vmul.f32 0.0078125, %v540_v19 }
 0x512   :  { %v568_v24 = vsub.f32 %v560_v22, %v564_v20  ;;  %v565_v25 = vmul.f32 %v545_v23, %v545_v23 }
 0x513   :  { %v552_v26 = vpop.xlane.xlu0 %551  ;;  %v556_v27 = vpop.xlane.xlu1 %555 }
 0x514   :  { %v572_v29 = vadd.f32 1e-05, %v568_v24  ;;  %v559_v30 = vmul.f32 0.0078125, %v552_v26  ;;  %v561_v31 = vmul.f32 0.0078125, %v556_v27 }
 0x516   :  { %1262 = vrsqrt.f32 %v572_v29  ;;  %v567_v32 = vsub.f32 %v559_v30, %v563_v28  ;;  %v569_v33 = vsub.f32 %v561_v31, %v565_v25 }
 0x517   :  { %v542_v34 = vpop.xlane.xlu0 %541 }
 0x518   :  { %v571_v35 = vadd.f32 1e-05, %v567_v32  ;;  %v573_v36 = vadd.f32 1e-05, %v569_v33  ;;  %v546_v37 = vmul.f32 0.0078125, %v542_v34  ;;  %v668_v33 = vld [vmem:[#allocation4 + $0x68] sm:$0xff] }
 0x519   :  { %v669_v34 = vld [vmem:[#allocation4 + $0x70] sm:$0xff] }
 0x51a   :  { %1264 = vrsqrt.f32 %v571_v35  ;;  %v566_v43 = vmul.f32 %v546_v37, %v546_v37  ;;  %v671_v35 = vld [vmem:[#allocation4 + $0x80] sm:$0xff] }
 0x51b   :  { %1266 = vrsqrt.f32 %v573_v36  ;;  %v558_v41 = vpop.xlane.xlu0 %557  ;;  %v672_v36 = vld [vmem:[#allocation4 + $0x88] sm:$0xff] }
 0x51c   :  { %v562_v44 = vmul.f32 0.0078125, %v558_v41  ;;  %v1353_v41 = vmov 6  }
 0x51e   :  { %v570_v45 = vsub.f32 %v562_v44, %v566_v43 }
 0x520   :  { %v1263_v46 = vpop.eup %1262  ;;  %v574_v47 = vadd.f32 1e-05, %v570_v45 }
 0x521   :  { %v580_v48 = vmul.f32 %v1263_v46, %v1437_v8 }
 0x522   :  { %1268 = vrsqrt.f32 %v574_v47 }
 0x523   :  { %v584_v49 = vmul.f32 %v580_v48, %v544_v17 }
 0x524   :  { %v1265_v50 = vpop.eup %1264 }
 0x525   :  { %v1267_v51 = vpop.eup %1266  ;;  %593 = vrot.lane.b32.xlu0 %v584_v49, %s1348_s2  ;;  %v579_v52 = vmul.f32 %v1265_v50, %v1431_v5 }
 0x526   :  { %v581_v54 = vmul.f32 %v1267_v51, %v1433_v6 }
 0x527   :  { %v583_v53 = vmul.f32 %v579_v52, %v543_v21 }
 0x528   :  { %v585_v55 = vmul.f32 %v581_v54, %v545_v23 }
 0x529   :  { %609 = vperm.xlu0 %1244, %v579_v52   ;;  %591 = vrot.lane.b32.xlu1 %v583_v53, %s1348_s2 }
 0x52c   :  { %v1269_v56 = vpop.eup %1268 }
 0x52d   :  { %595 = vrot.lane.b32.xlu1 %v585_v55, %s1348_s2  ;;  %v582_v57 = vmul.f32 %v1269_v56, %v1439_v10  ;;  %1246 = vset.pattern.permute.xlu0 %v1351_v58 }
 0x52f   :  { %v586_v38 = vmul.f32 %v582_v57, %v546_v37  ;;  %v840_v37 = vld [vmem:[#allocation4 + $0x90] sm:$0xff] }
 0x530   :  { %1165 = vmatprep.mubr.msk.f32.mxu0 %vm854_vm1, %v840_v37 }
 0x531   :  { %597 = vrot.lane.b32.xlu1 %v586_v38, %s1348_s2 }
 0x535   :  { %614 = vperm.xlu1 %1245, %v580_v48  }
 0x539   :  { %619 = vperm.xlu1 %1245, %v581_v54  }
 0x53d   :  { %624 = vperm.xlu1 %1245, %v582_v57  }
 0x541   :  { %1247 = vset.pattern.permute.xlu1 %v1351_v58 }
 0x597   :  { %v594_v59 = vpop.permute.xlu0 %593 }
 0x598   :  { %v604_v60 = vsub.f32 %v1437_v8, %v594_v59 }
 0x59a   :  { %638 = vperm.xlu0 %1246, %v604_v60  }
 0x59b   :  { %v592_v61 = vpop.permute.xlu1 %591 }
 0x59c   :  { %v603_v39 = vsub.f32 %v1431_v5, %v592_v61 }
 0x59e   :  { %633 = vperm.xlu1 %1247, %v603_v39  }
 0x59f   :  { %v596_v62 = vpop.permute.xlu1 %595 }
 0x5a0   :  { %v605_v63 = vsub.f32 %v1433_v6, %v596_v62 }
 0x5a2   :  { %643 = vperm.xlu0 %1246, %v605_v63  }
 0x5a3   :  { %v598_v42 = vpop.permute.xlu1 %597 }
 0x5a4   :  { %v606_v0 = vsub.f32 %v1439_v10, %v598_v42 }
 0x5a6   :  { %648 = vperm.xlu1 %1247, %v606_v0   ;;  %1248 = vset.pattern.permute.xlu0 %v1352_v40 }
 0x5a7   :  { %681 = vperm.xlu0 %1248, %v1431_v5  }
 0x5a8   :  { %v610_v14 = vpop.permute.xlu0 %609 }
 0x5a9   :  { %v627_v19 = vmul.f32 %v610_v14, %v1493_v3 }
 0x5aa   :  { %1249 = vset.pattern.permute.xlu1 %v1352_v40 }
 0x5ab   :  { %686 = vperm.xlu1 %1249, %v1437_v8   ;;  %696 = vperm.xlu0 %1248, %v1439_v10  }
 0x5af   :  { %691 = vperm.xlu1 %1249, %v1433_v6   ;;  %706 = vperm.xlu0 %1248, %v678_v7  }
 0x5b3   :  { %701 = vperm.xlu1 %1249, %v677_v11   ;;  %1251 = vset.pattern.permute.xlu0 %v1353_v41 }
 0x5b4   :  { %v615_v12 = vpop.permute.xlu1 %614  ;;  %851 = vperm.xlu0 %1251, %v1437_v8  }
 0x5b5   :  { %v628_v15 = vmul.f32 %v1490_v2, %v615_v12 }
 0x5b7   :  { %1250 = vset.pattern.permute.xlu1 %v1353_v41 }
 0x5b8   :  { %v620_v13 = vpop.permute.xlu1 %619  ;;  %846 = vperm.xlu1 %1250, %v1431_v5  }
 0x5b9   :  { %v629_v6 = vmul.f32 %v620_v13, %v1500_v9 }
 0x5bc   :  { %v625_v16 = vpop.permute.xlu1 %624 }
 0x5bd   :  { %v630_v2 = vmul.f32 %v1496_v4, %v625_v16  ;;  %v670_v4 = vld [vmem:[#allocation4 + $0x78] sm:$0xff]  ;;  %v1354_v16 = vmov 0.0|0.0  }
 0x619   :  { %v639_v17 = vpop.permute.xlu0 %638 }
 0x61a   :  { %v652_v18 = vadd.f32 %v639_v17, %v628_v15  ;;  %v841_v15 = vld [vmem:[#allocation4 + $0x98] sm:$0xff]  ;;  %v1356_v17 = vmov 0.0  }
 0x61c   :  { %v660_v21 = vmul.f32 0.01, %v652_v18  ;;  %vm656_vm13 = vcmp.gt.f32.partialorder %v652_v18, 0.0 }
 0x61d   :  { %v634_v20 = vpop.permute.xlu1 %633 }
 0x61e   :  { %v651_v22 = vadd.f32 %v634_v20, %v627_v19  ;;  %v664_v26 = vsel %vm656_vm13, %v652_v18, %v660_v21  ;;  %v1357_v18 = vmov 7  }
 0x61f   :  { %1252 = vset.pattern.permute.xlu1 %v1357_v18  ;;  %1253 = vset.pattern.permute.xlu0 %v1357_v18 }
 0x620   :  { %vm655_vm14 = vcmp.gt.f32.partialorder %v651_v22, 0.0  ;;  %v659_v10 = vmul.f32 0.01, %v651_v22  ;;  %946 = vperm.xlu1 %1252, %v1431_v5  }
 0x621   :  { %v644_v23 = vpop.permute.xlu0 %643 }
 0x622   :  { %v653_v24 = vadd.f32 %v644_v23, %v629_v6  ;;  %v663_v25 = vsel %vm655_vm14, %v651_v22, %v659_v10 }
 0x623   :  { %v1197_v27 = vpack.c.bf16 %v664_v26, %v663_v25 }
 0x624   :  { %v661_v29 = vmul.f32 0.01, %v653_v24  ;;  %vm657_vm15 = vcmp.gt.f32.partialorder %v653_v24, 0.0 }
 0x625   :  { %1198 = vmatprep.subr.bf16.mxu1 %v1197_v27  ;;  %v649_v28 = vpop.permute.xlu1 %648 }
 0x626   :  { %v654_v30 = vadd.f32 %v649_v28, %v630_v2  ;;  %1200 = vmatpush3.bf16.msra.mxu1 %v1197_v27  ;;  %v665_v31 = vsel %vm657_vm15, %v653_v24, %v661_v29  ;;  %v682_v43 = vpop.permute.xlu0 %681  ;;  %v942_v2 = vld [vmem:[#allocation4 + $0xa0] sm:$0xff] }
 0x628   :  { %vm658_vm0 = vcmp.gt.f32.partialorder %v654_v30, 0.0  ;;  %v662_v3 = vmul.f32 0.01, %v654_v30 }
 0x62a   :  { %v666_v32 = vsel %vm658_vm0, %v654_v30, %v662_v3  ;;  %v687_v44 = vpop.permute.xlu1 %686  ;;  %v697_v48 = vpop.permute.xlu0 %696 }
 0x62b   :  { %v1201_v9 = vpack.c.bf16 %v666_v32, %v665_v31 }
 0x62d   :  { %1202 = vmatprep.subr.bf16.mxu1 %v1201_v9 }
 0x62e   :  { %1204 = vmatpush3.bf16.msra.mxu1 %v1201_v9  ;;  %v692_v50 = vpop.permute.xlu1 %691  ;;  %v707_v59 = vpop.permute.xlu0 %706 }
 0x631   :  { %1145 = vmatmul.mubr.msk.f32.vlgmr.msra.gmra.mrb[4].mxu1 %vm203_vm4, %v668_v33 }
 0x632   :  { %1147 = vmatprep.mubr.msk.f32.mxu1 %vm203_vm4, %v669_v34  ;;  %v702_v39 = vpop.permute.xlu1 %701 }
 0x633   :  { %v852_v19 = vpop.permute.xlu0 %851 }
 0x635   :  { %1148 = vmatmul.mubr.msk.f32.gmra.mrb[6].mxu1 %vm203_vm4, %v670_v4 }
 0x636   :  { %1150 = vmatprep.mubr.msk.f32.mxu1 %vm203_vm4, %v671_v35 }
 0x637   :  { %v847_v20 = vpop.permute.xlu1 %846 }
 0x639   :  { %1151 = vmatmul.mubr.msk.f32.gmra.mrb[8].mxu1 %vm203_vm4, %v672_v36 }
 0x69f   :  { %v947_v28 = vpop.permute.xlu1 %946 }
 0x704   :  { %v1146_v45 = vpop.f32.mrb[4].mxu1 }
 0x705   :  { %v799_v46 = vadd.f32 %v1146_v45, %v687_v44  ;;  %v793_v47 = vpop.f32.mrb[5].mxu1 }
 0x706   :  { %v794_v49 = vadd.f32 %v793_v47, %v682_v43 }
 0x707   :  { %vm823_vm2 = vcmp.gt.f32.partialorder %v799_v46, 0.0  ;;  %v829_v51 = vmul.f32 0.01, %v799_v46 }
 0x708   :  { %vm822_vm3 = vcmp.gt.f32.partialorder %v794_v49, 0.0  ;;  %v828_v52 = vmul.f32 0.01, %v794_v49  ;;  %v1149_v53 = vpop.f32.mrb[6].mxu1 }
 0x709   :  { %v809_v54 = vadd.f32 %v1149_v53, %v697_v48  ;;  %v803_v55 = vpop.f32.mrb[7].mxu1  ;;  %v835_v56 = vsel %vm823_vm2, %v799_v46, %v829_v51 }
 0x70a   :  { %v804_v57 = vadd.f32 %v803_v55, %v692_v50  ;;  %v834_v8 = vsel %vm822_vm3, %v794_v49, %v828_v52 }
 0x70b   :  { %vm825_vm4 = vcmp.gt.f32.partialorder %v809_v54, 0.0  ;;  %v831_v58 = vmul.f32 0.01, %v809_v54  ;;  %v1205_v38 = vpack.c.bf16 %v835_v56, %v834_v8 }
 0x70c   :  { %vm824_vm5 = vcmp.gt.f32.partialorder %v804_v57, 0.0  ;;  %v830_v60 = vmul.f32 0.01, %v804_v57  ;;  %v1152_v61 = vpop.f32.mrb[8].mxu1 }
 0x70d   :  { %v819_v62 = vadd.f32 %v1152_v61, %v707_v59  ;;  %v813_v63 = vpop.f32.mrb[9].mxu1  ;;  %1206 = vmatprep.subr.bf16.mxu0 %v1205_v38  ;;  %v837_v42 = vsel %vm825_vm4, %v809_v54, %v831_v58 }
 0x70e   :  { %v814_v0 = vadd.f32 %v813_v63, %v702_v39  ;;  %1208 = vmatpush3.bf16.msra.mxu0 %v1205_v38  ;;  %v836_v1 = vsel %vm824_vm5, %v804_v57, %v830_v60 }
 0x70f   :  { %vm827_vm6 = vcmp.gt.f32.partialorder %v819_v62, 0.0  ;;  %v833_v40 = vmul.f32 0.01, %v819_v62  ;;  %v1209_v7 = vpack.c.bf16 %v837_v42, %v836_v1 }
 0x710   :  { %vm826_vm7 = vcmp.gt.f32.partialorder %v814_v0, 0.0  ;;  %v832_v11 = vmul.f32 0.01, %v814_v0 }
 0x711   :  { %1210 = vmatprep.subr.bf16.mxu0 %v1209_v7  ;;  %v839_v12 = vsel %vm827_vm6, %v819_v62, %v833_v40 }
 0x712   :  { %1212 = vmatpush3.bf16.msra.mxu0 %v1209_v7  ;;  %v838_v13 = vsel %vm826_vm7, %v814_v0, %v832_v11 }
 0x713   :  { %v1213_v14 = vpack.c.bf16 %v839_v12, %v838_v13 }
 0x715   :  { %1214 = vmatprep.subr.bf16.mxu0 %v1213_v14 }
 0x716   :  { %1216 = vmatpush3.bf16.msra.mxu0 %v1213_v14 }
 0x717   :  { %1217 = vmatprep.subr.bf16.mxu0 %v1354_v16 }
 0x719   :  { %1166 = vmatmul.mubr.msk.f32.vlgmr.msra.gmra.mrb[8].mxu0 %vm854_vm1, %v841_v15 }
 0x71a   :  { %1172 = vmatprep.mubr.msk.f32.mxu0 %vm1355_vm8, %v1356_v17 }
 0x7ec   :  { %v1167_v21 = vpop.f32.mrb[8].mxu0 }
 0x7ed   :  { %v933_v22 = vadd.f32 %v1167_v21, %v852_v19  ;;  %v927_v6 = vpop.f32.mrb[9].mxu0 }
 0x7ee   :  { %v928_v10 = vadd.f32 %v927_v6, %v847_v20 }
 0x7ef   :  { %vm937_vm9 = vcmp.gt.f32.partialorder %v933_v22, 0.0  ;;  %v939_v23 = vmul.f32 0.01, %v933_v22 }
 0x7f0   :  { %vm936_vm10 = vcmp.gt.f32.partialorder %v928_v10, 0.0  ;;  %v938_v24 = vmul.f32 0.01, %v928_v10 }
 0x7f1   :  { %v941_v25 = vsel %vm937_vm9, %v933_v22, %v939_v23 }
 0x7f2   :  { %v940_v26 = vsel %vm936_vm10, %v928_v10, %v938_v24 }
 0x7f3   :  { %v1218_v27 = vpack.c.bf16 %v941_v25, %v940_v26 }
 0x7f5   :  { %1219 = vmatpush3.bf16.msra.mxu0 %v1218_v27 }
 0x7f8   :  { %1173 = vmatmul.mubr.msk.f32.vlgmr.msra.gmra.mrb[10].mxu0 %vm949_vm11, %v942_v2 }
 0x8cb   :  { %v1019_v29 = vpop.f32.mrb[10].mxu0 }
 0x8cc   :  { %v1020_v5 = vadd.f32 %v1019_v29, %v947_v28  ;;  %v1174_v30 = vpop.f32.mrb[11].mxu0 }
 0x8ce   :  { %vm1023_vm12 = vcmp.gt.f32.partialorder %v1020_v5, 0.0  ;;  %v1024_v3 = vmul.f32 0.01, %v1020_v5 }
 0x8d0   :  { %v1025_v31 = vsel %vm1023_vm12, %v1020_v5, %v1024_v3 }
 0x8d1   :  { %1026 = vst [vmem:[%s1547_s3] sm:$0xff] %v1025_v31 }
 0x8d2   :  { %1031 = vsyncpa [#allocation3], 1 }
 0x8d3   :  { %1032 = vsyncpa [#allocation5], 1 }

</bundles_post_ra>
